<compile_context>
chip_gen: v6e
topology: v6e:2x2x1
jax: 0.10.0
libtpu: 0.0.40
codegen_flags: <defaults>
</compile_context>

<pallas_src>
import jax
import jax.numpy as jnp
from jax.experimental import pallas as pl
from jax.experimental.pallas import tpu as pltpu


# ----------------------------- kernels ------------------------------------ #

def _gaussian_kernel_bias(x_ref, c2_ref, b_ref, o_ref):
    # c2_ref holds neg_c2 = -(one_over_c^2);  exp(neg_c2 * d * d) == exp(-((d*c)^2))
    d = x_ref[...].astype(jnp.float32) - b_ref[...]
    o_ref[...] = jnp.exp(c2_ref[...] * d * d).astype(o_ref.dtype)


def _gaussian_kernel_nobias(x_ref, c2_ref, o_ref):
    x = x_ref[...].astype(jnp.float32)
    o_ref[...] = jnp.exp(c2_ref[...] * x * x).astype(o_ref.dtype)


# ----------------------------- budgets / tiling ----------------------------- #

def _vmem_budgets():
    """(target_x_tile_bytes, working_budget_bytes, vmem_limit_bytes), chip-gated."""
    # Conservative defaults, safe on v7x (64 MiB physical, 32 MiB scoped per TC).
    target_x_tile = 4 << 20
    working_budget = 24 << 20
    vmem_limit = 32 << 20
    try:
        info = pltpu.get_tpu_info()
        vmem_cap = getattr(info, "vmem_capacity_bytes", None)
        if vmem_cap is not None and vmem_cap >= (100 << 20):
            # v5e / v6e: 128 MiB physical VMEM -> bigger tiles are free.
            target_x_tile = 8 << 20
            working_budget = 48 << 20
            vmem_limit = 64 << 20
    except Exception:
        pass
    return target_x_tile, working_budget, vmem_limit


def _choose_tiles(B, size, x_itemsize, out_itemsize, n_params,
                  target_x_tile, working_budget):
    """Pick (tb, ts) row/lane tile sizes.  Accounts double-buffered x, out and
    the (1, ts) param rows.  Never pads: ragged edges become partial blocks."""
    # Sublane alignment for the row dim follows dtype packing on both paths.
    def _sub(itemsize):
        return {1: 32, 2: 16}.get(itemsize, 8)
    sub = max(_sub(x_itemsize), _sub(out_itemsize))

    per_elem = x_itemsize + out_itemsize          # x + out streams, per element
    param_bytes = 2 * n_params * 4                # double-buffered f32 param rows, per lane

    def max_tb_for(ts):
        avail = working_budget - param_bytes * ts
        if avail <= 0:
            return 0
        return avail // (2 * ts * per_elem)

    # --- lane (last-dim) tile: prefer the full row ---------------------------
    # block dim == full array dim bypasses the 128-divisibility rule, gives one
    # contiguous DMA per row-block, and keeps the param rows resident.
    if max_tb_for(size) >= min(sub, B):
        ts = size
    else:
        # Enormous rows: chunk lanes in multiples of 128 (last chunk may be partial).
        ts = (working_budget // (2 * sub * per_elem + param_bytes)) // 128 * 128
        ts = max(128, min(ts, max(128, (size // 128) * 128)))

    # --- row tile ------------------------------------------------------------
    tb = max(1, target_x_tile // (ts * x_itemsize))
    tb = min(tb, max_tb_for(ts))
    # Keep >= 2 row-grid steps when the batch allows (megacore sharding on v7x).
    if B > sub:
        half_rows = -(-B // 2)                         # cdiv(B, 2)
        half_rows = -(-half_rows // sub) * sub         # round up to sublane pack
        tb = min(tb, half_rows)
    if tb >= B:
        tb = B                                         # full dim: no alignment needed
    else:
        tb = max(sub, (tb // sub) * sub)               # sublane-pack aligned

    # --- v7x guard: never leave a (1, 1) grid --------------------------------
    row_steps = -(-B // tb)
    lane_steps = -(-size // ts)
    if row_steps == 1 and lane_steps == 1 and size >= 256:
        half_lanes = ((-(-size // 2)) // 128) * 128    # cdiv(size,2) rounded down to 128
        if half_lanes >= 128:
            ts = half_lanes                            # >= 2 lane steps -> both TCs busy
    return tb, ts


# ----------------------------- wrapper ------------------------------------- #

def gaussian_simple(x, one_over_c, bias=None, *, out_dtype=None):
    """x: (..., size); one_over_c: (size,); bias: (size,) or None.

    Returns exp(-(((x - bias) if bias is not None else x) * one_over_c)^2),
    matching Gaussian_simple.forward.  Compute is f32 in-kernel; output dtype
    is `out_dtype` (default: x.dtype; pass jnp.bfloat16 to cut output traffic).
    """
    orig_shape = x.shape
    size = orig_shape[-1]
    B = 1
    for d in orig_shape[:-1]:
        B *= d
    x2 = x.reshape(B, size)

    out_dtype = x.dtype if out_dtype is None else jnp.dtype(out_dtype)

    # Pre-fold the squared/negated scale into the tiny (size,) parameter.
    c = one_over_c.astype(jnp.float32)
    neg_c2_row = (-(c * c)).reshape(1, size)
    b_row = None if bias is None else bias.reshape(1, size).astype(jnp.float32)
    n_params = 1 if b_row is None else 2

    target_x_tile, working_budget, vmem_limit = _vmem_budgets()
    tb, ts = _choose_tiles(
        B, size,
        jnp.dtype(x2.dtype).itemsize, jnp.dtype(out_dtype).itemsize,
        n_params, target_x_tile, working_budget,
    )
    grid = (pl.cdiv(B, tb), pl.cdiv(size, ts))

    x_spec = pl.BlockSpec((tb, ts), lambda i, j: (i, j))
    p_spec = pl.BlockSpec((1, ts), lambda i, j: (0, j))   # param rows, resident per lane-chunk
    o_spec = pl.BlockSpec((tb, ts), lambda i, j: (i, j))

    if b_row is None:
        kernel = _gaussian_kernel_nobias
        in_specs = [x_spec, p_spec]
        args = (x2, neg_c2_row)
    else:
        kernel = _gaussian_kernel_bias
        in_specs = [x_spec, p_spec, p_spec]
        args = (x2, neg_c2_row, b_row)

    out = pl.pallas_call(
        kernel,
        out_shape=jax.ShapeDtypeStruct((B, size), out_dtype),
        grid_spec=pl.GridSpec(grid=grid, in_specs=in_specs, out_specs=o_spec),
        compiler_params=pltpu.CompilerParams(
            dimension_semantics=("parallel", "parallel"),
            vmem_limit_bytes=vmem_limit,
        ),
    )(*args)

    return out.reshape(orig_shape)


# ----------------------------- demo / self-check --------------------------- #

if __name__ == "__main__":
    key = jax.random.PRNGKey(0)
    k1, k2, k3 = jax.random.split(key, 3)

    # Case 1: module defaults (bias=False, init_shrink_factor=1.0), lane-dense size.
    B1, S1 = 16, 128
    x1 = jax.random.normal(k1, (B1, S1), dtype=jnp.float32)
    one_over_c1 = jnp.full((S1,), 1.0, dtype=jnp.float32)
    out1 = jax.block_until_ready(gaussian_simple(x1, one_over_c1))
    ref1 = jnp.exp(-jnp.square(x1 * one_over_c1[None, :]))
    assert jnp.allclose(out1, ref1, atol=1e-6, rtol=1e-4), "mismatch (no-bias case)"

    # Case 2: bias=True, ND input, size NOT a multiple of 128 -> full-dim block
    # (no wrapper pad / slice anymore).
    S2 = 96
    x2 = jax.random.normal(k2, (2, 4, S2), dtype=jnp.float32)
    one_over_c2 = 1.0 + 0.5 * jax.random.normal(k3, (S2,), dtype=jnp.float32)
    bias2 = 0.1 * jax.random.normal(k1, (S2,), dtype=jnp.float32)
    out2 = jax.block_until_ready(gaussian_simple(x2, one_over_c2, bias2))
    ref2 = jnp.exp(-jnp.square((x2 - bias2) * one_over_c2))
    assert jnp.allclose(out2, ref2, atol=1e-6, rtol=1e-4), "mismatch (bias case)"

    # Case 3: small batch + size >= 256 and not a multiple of 128: exercises the
    # (1,1)-grid lane-split guard and a partial (masked) last lane block.
    B3, S3 = 4, 320
    x3 = jax.random.normal(k2, (B3, S3), dtype=jnp.float32)
    one_over_c3 = 1.0 + 0.25 * jax.random.normal(k1, (S3,), dtype=jnp.float32)
    bias3 = 0.05 * jax.random.normal(k3, (S3,), dtype=jnp.float32)
    out3 = jax.block_until_ready(gaussian_simple(x3, one_over_c3, bias3))
    ref3 = jnp.exp(-jnp.square((x3 - bias3) * one_over_c3))
    assert jnp.allclose(out3, ref3, atol=1e-6, rtol=1e-4), "mismatch (lane-split case)"

    print("KERNEL_OK")
</pallas_src>

<mosaic_0001>
module attributes {stable_mosaic.version = 11 : i64} {
  func.func @_gaussian_kernel_nobias(%arg0: i32, %arg1: i32, %arg2: memref<8x128xf32, #tpu.memory_space<vmem>>, %arg3: memref<1x128xf32, #tpu.memory_space<vmem>>, %arg4: memref<8x128xf32, #tpu.memory_space<vmem>>) attributes {dimension_semantics = [#tpu.dimension_semantics<parallel>, #tpu.dimension_semantics<parallel>], iteration_bounds = array<i64: 2, 1>, scalar_prefetch = 0 : i64, scratch_operands = 0 : i64, tpu.core_type = #tpu.core_type<tc>, window_params = [{transform_indices = @transform_0, window_bounds = array<i64: 8, 128>}, {transform_indices = @transform_1, window_bounds = array<i64: 1, 128>}, {transform_indices = @transform_2, window_bounds = array<i64: 8, 128>}]} {
    %c0 = arith.constant 0 : index
    %c0_0 = arith.constant 0 : index
    %0 = vector.load %arg2[%c0, %c0_0] : memref<8x128xf32, #tpu.memory_space<vmem>>, vector<8x128xf32>
    %c0_1 = arith.constant 0 : index
    %c0_2 = arith.constant 0 : index
    %1 = vector.load %arg3[%c0_1, %c0_2] : memref<1x128xf32, #tpu.memory_space<vmem>>, vector<1x128xf32>
    %2 = vector.broadcast %1 : vector<1x128xf32> to vector<8x128xf32>
    %3 = arith.mulf %2, %0 : vector<8x128xf32>
    %4 = arith.mulf %3, %0 : vector<8x128xf32>
    %5 = math.exp %4 : vector<8x128xf32>
    %c0_3 = arith.constant 0 : index
    %c0_4 = arith.constant 0 : index
    %6 = vector.load %arg4[%c0_3, %c0_4] : memref<8x128xf32, #tpu.memory_space<vmem>>, vector<8x128xf32>
    tpu.vector_store %arg4[%c0_3, %c0_4], %5 {strides = array<i32>} : memref<8x128xf32, #tpu.memory_space<vmem>>, vector<8x128xf32>,
    return
  }
  func.func @transform_0(%arg0: i32, %arg1: i32) -> (i32, i32) {
    %c0_i32 = arith.constant 0 : i32
    return %arg0, %arg1 : i32, i32
  }
  func.func @transform_1(%arg0: i32, %arg1: i32) -> (i32, i32) {
    %c0_i32 = arith.constant 0 : i32
    %c0_i32_0 = arith.constant 0 : i32
    return %c0_i32, %arg1 : i32, i32
  }
  func.func @transform_2(%arg0: i32, %arg1: i32) -> (i32, i32) {
    %c0_i32 = arith.constant 0 : i32
    return %arg0, %arg1 : i32, i32
  }
}

</mosaic_0001>

<bundles_post_ra>
// kernel: tpu_custom_call.1
= control target key start
LH: loop header
LB: loop body
LE: loop exit
PB: predicated region body
PF: predicated region fallthrough
CT: control target
= control target key end

     0   :  { %7 = vsyncpa [#allocation3], 0  ;;  %s659_s0 = inlined_call_operand.hbm [shape: f32[16,128], index: 0, kind: input, shape index: {}]   ;;  %s660_s1 = inlined_call_operand.vmem [shape: f32[1,128], index: 1, kind: input, shape index: {}]   ;;  %s661_s2 = inlined_call_operand.hbm [shape: f32[16,128], index: 2, kind: output, shape index: {}]  }
   0x1   :  { %9 = vsyncpa [#allocation3 + $0x1], 0 }
   0x2   :  { %10 = vsyncpa [#allocation4], 0 }
   0x3   :  { %12 = vsyncpa [#allocation4 + $0x1], 0  ;;  %s516_s9 = smov 0   ;;  %s518_s10 = smov 0  }
   0x4   :  { %s520_s11 = smov 0   ;;  %s522_s12 = smov 0  }
   0x5   :  { %s524_s13 = smov 0   ;;  %s526_s14 = smov 0  }
   0x6 LB: > { %s310_s15 = sadd.s32 4294967295, %s497_s14   ;;  %s311_s16 = sadd.s32 4294967294, %s497_s14   ;;  %s497_s14 = sphi %s526_s14, %s18_s14   ;;  %s493_s13 = sphi %s524_s13, %s673_s13   ;;  %s489_s12 = sphi %s522_s12, %s672_s12   ;;  %s485_s11 = sphi %s520_s11, %s671_s11   ;;  %s481_s10 = sphi %s518_s10, %s670_s10   ;;  %s477_s9 = sphi %s516_s9, %s669_s9  }
   0x7   : > { %s30_s17 = sadd.s32 1, %s493_s13  ;;  %s39_s18 = sadd.s32 1, %s485_s11 }
   0x8   : > { %p32_p0 = scmp.ge.s32.totalorder %s30_s17, 2  ;;  %p46_p1 = scmp.ne.s32.totalorder %s485_s11, %s481_s10 }
   0x9   : > { %p47_p2 = scmp.eq.s32.totalorder %s497_s14, 0  ;;  %p52_p3 = scmp.ne.s32.totalorder %s481_s10, %s477_s9 }
   0xa   : > { %s675_s17 = smov (%p32_p0, %s30_s17), 0  ;;  %p53_p5 = scmp.eq.s32.totalorder %s310_s15, 0 }
   0xb   : > { %p557_p4 = por %p47_p2, %p46_p1  ;;  %s34_s20 = ssub.s32 %s493_s13, %s675_s17 }
   0xc   : > { %p104_p6 = scmp.eq.s32.totalorder %s310_s15, 1  ;;  %p37_p7 = scmp.eq.s32.totalorder %s34_s20, 0 }
   0xd   : > { %p563_p8 = por %p53_p5, %p52_p3  ;;  %p110_p10 = scmp.eq.s32.totalorder %s311_s16, 1 }
   0xe   : > { %p567_p9 = por %p104_p6, %p46_p1  ;;  %p337_p13 = scmp.lt.s32.totalorder %s497_s14, 2 }
   0xf   : > { %s572_s23 = scalar_select %p37_p7, %s485_s11, %s39_s18  }
  0x10   : > { %p574_p11 = por %p110_p10, %p52_p3  ;;  %s136_s25 = sand.u32 1, %s485_s11  }
  0x11   : > { %s315_s26 = sshll.u32 %s136_s25, 3  ;;  %s316_s27 = sshll.u32 %s493_s13, 7 }
  0x12   : > { %s665_s24 = scalar_select %p574_p11, 1, 0 }
  0x13   : > { %s146_s30 = scalar_lea.hbm %s659_s0, %s316_s27  ;;  %s140_s3 = scalar_lea.vmem [#allocation2], %s315_s26 }
  0x14   : > { %s148_s4 = sshll.u32 %s140_s3, 4  ;;  %p587_p0 = pnand %p337_p13, %p557_p4  ;;  %s149_s4 = int_to_ptr.vmem [resolvable:$true] %s148_s4 }
  0x15   : > { %p317_p1 = scmp.ge.s32.totalorder %s497_s14, 1  ;;  %p153_p2 = scmp.lt.s32.totalorder %s497_s14, 3 }
  0x16   : > { %s137_s6 = scalar_lea.sflag [#allocation3], %s136_s25  ;;  %p391_p3 = pneg %p587_p0 }
  0x17   : > { %s402_s7 = scalar_lea.vmem %s149_s4, 128  ;;  %s499_s8 = smov [#allocation2]  }
  0x18   : > { %p403_p5 = scmp.ne.s32.totalorder %s149_s4, %s402_s7  ;;  %s407_s15 = sshll.u32 %s499_s8, 4  ;;  %s408_s15 = int_to_ptr.vmem [resolvable:$false] %s407_s15 }
  0x19   : > { %s409_s16 = scalar_lea.vmem %s408_s15, 256  ;;  %p410_p10 = scmp.lt.s32.totalorder %s149_s4, %s408_s15 }
  0x1a   : > { %p405_p6 = pnand %p403_p5, %p391_p3  ;;  %p411_p12 = scmp.lt.s32.totalorder %s409_s16, %s402_s7 }
  0x1c   : > { %p406_p7 = pneg %p405_p6  ;;  %p412_p4 = por %p411_p12, %p410_p10 }
  0x1e   : > { %p413_p13 = pnand %p412_p4, %p406_p7 }
  0x20   : > { %416 = shalt.err (!%p413_p13)
}
  0x21   : > { %332 = dma.hbm_to_vmem [thread:$0]  (!%p587_p0), %s146_s30, 128, %s149_s4, %s137_s6  }
  0x22   : > { %p154_p11 = pnand %p317_p1, %p153_p2 }
  0x23   : > { %s602_s18 = sand.u32 (!%p154_p11), 1, %s481_s10  }
  0x24   : > { %157 = sbr.rel (%p154_p11) target bundleno = 77 (0x4d), region = 28  ;;  %s318_s19 = sshll.u32 (!%p154_p11), %s602_s18, 3 }
  0x25   : > { %s160_s20 = scalar_lea.sflag (!%p154_p11), [#allocation3], %s602_s18  ;;  %s163_s25 = scalar_lea.vmem (!%p154_p11), [#allocation2], %s318_s19 }
  0x29   : > { %468 = dma.done.wait (%p563_p8), %s160_s20, 128  }
  0x2a   : > { %470 = vsyncadd (%p563_p8), %s160_s20, 4294967168  ;;  %v190_v0 = vld [vmem:[%s163_s25] sm:$0xff]  ;;  %s186_s28 = scalar_lea.vmem [#allocation5], %s318_s19  ;;  %s322_s30 = sshll.u32 %s489_s12, 7 }
  0x2b   : > { %v320_v1 = vld [vmem:[%s660_s1] ss:$0 sm:$0xff]  ;;  %s218_s29 = sshll.u32 %s186_s28, 4  ;;  %s216_s4 = scalar_lea.hbm %s661_s2, %s322_s30  ;;  %s614_s29 = int_to_ptr.vmem [resolvable:$true] %s218_s29 }
  0x2c   : > { %v198_v2 = vmul.f32 %v320_v1, %v190_v0  ;;  %s204_s5 = scalar_lea.sflag [#allocation4], %s602_s18  ;;  %s417_s6 = scalar_lea.vmem %s614_s29, 128 }
  0x2d   : > { %p418_p8 = scmp.ne.s32.totalorder %s614_s29, %s417_s6  ;;  %s500_s7 = smov [#allocation5]  }
  0x2e   : > { %v199_v3 = vmul.f32 %v198_v2, %v190_v0  ;;  %s421_s8 = sshll.u32 %s500_s7, 4  ;;  %s422_s8 = int_to_ptr.vmem [resolvable:$false] %s421_s8 }
  0x2f   : > { %p419_p11 = pnand %p418_p8, %p567_p9  ;;  %s423_s12 = scalar_lea.vmem %s422_s8, 256 }
  0x30   : > { %v200_v4 = vmul.f32 1.442695, %v199_v3  ;;  %p424_p0 = scmp.lt.s32.totalorder %s614_s29, %s422_s8  ;;  %p425_p1 = scmp.lt.s32.totalorder %s423_s12, %s417_s6 }
  0x31   : > { %p420_p12 = pneg %p419_p11 }
  0x32   : > { %387 = vpow2.f32 %v200_v4  ;;  %p426_p2 = por %p425_p1, %p424_p0 }
  0x34   : > { %p427_p3 = pnand %p426_p2, %p420_p12 }
  0x3f   : > { %v388_v5 = vpop.eup %387 }
  0x40   : > { %202 = vst [vmem:[%s186_s28] sm:$0xff] %v388_v5 }
  0x41   : > { %430 = shalt.err (!%p427_p3)
}
  0x42   : > { %s431_s15 = scalar_lea.hbm %s216_s4, 128  ;;  %s435_s19 = scalar_lea.hbm %s661_s2, 256 }
  0x43   : > { %p432_p5 = scmp.ne.s32.totalorder %s216_s4, %s431_s15  ;;  %p436_p10 = scmp.lt.s32.totalorder %s216_s4, %s661_s2 }
  0x44   : > { %p437_p4 = scmp.lt.s32.totalorder %s435_s19, %s431_s15 }
  0x45   : > { %p433_p6 = pnand %p432_p5, %p567_p9 }
  0x46   : > { %p438_p13 = por %p437_p4, %p436_p10 }
  0x47   : > { %p434_p7 = pneg %p433_p6 }
  0x49   : > { %p439_p8 = pnand %p438_p13, %p434_p7 }
  0x4b   : > { %442 = shalt.err (!%p439_p8)
}
  0x4c   : > { %327 = dma.vmem_to_hbm [thread:$0]  (%p567_p9), %s614_s29, 128, %s216_s4, %s204_s5  }
  0x4d PF: > { %s230_s26 = sand.u32 1, %s477_s9   ;;  %p667_p11 = scmp.ne.s32.totalorder %s665_s24, 0 }
  0x4e   : > { %p668_p12 = scmp.ge.s32.totalorder %s497_s14, 2  ;;  %s231_s27 = scalar_lea.sflag [#allocation4], %s230_s26 }
  0x50   : > { %p334_p0 = pnand %p668_p12, %p667_p11 }
  0x52   : > { %p335_p1 = pneg %p334_p0 }
  0x54   : > { %472 = dma.done.wait (%p335_p1), %s231_s27, 128  }
  0x55   : > { %474 = vsyncadd (%p335_p1), %s231_s27, 4294967168  ;;  %s18_s14 = sadd.s32 1, %s497_s14   ;;  %s669_s9 = smov %s481_s10 }
  0x56   : > { %p15_p2 = scmp.ge.s32.totalorder %s18_s14, 4   ;;  %s670_s10 = smov %s485_s11 }
  0x57   : > { %s671_s11 = smov %s572_s23  ;;  %s672_s12 = smov %s493_s13 }
  0x58   : > { %s673_s13 = smov %s675_s17  ;;  %17 = sbr.rel (!%p15_p2) target bundleno = 6 (0x6), region = 76 }
  0x5d   :  { %236 = vsyncpa [#allocation3], 1 }
  0x5e   :  { %238 = vsyncpa [#allocation3 + $0x1], 1 }
  0x5f   :  { %239 = vsyncpa [#allocation4], 1 }
  0x60   :  { %241 = vsyncpa [#allocation4 + $0x1], 1 }

</bundles_post_ra>
